<compile_context>
chip_gen: v7x
topology: tpu7x:2x2x1
jax: 0.10.0
libtpu: 0.0.40
codegen_flags: <defaults>
</compile_context>

<pallas_src>
import functools

import jax
import jax.numpy as jnp
from jax.experimental import pallas as pl
from jax.experimental.pallas import tpu as pltpu


def _round_up(x, m):
    return ((x + m - 1) // m) * m


def _score_kernel(*refs, compute_dtype, has_mask):
    # refs (has_mask=True):
    #   x_ref   : (1, TILE_L, I)  num_embeddings tile, native dtype (f32 or bf16)
    #   wi_ref  : (I, H)          input half of attn.weight (transposed), compute dtype
    #   h_ref   : (1, 1, H) f32   hidden @ W_h.T + bias for this batch row
    #   ws_ref  : (1, H)          score weight row, compute dtype
    #   mask_ref: (1, 1, TILE_L) int8, nonzero => masked
    #   out_ref : (1, 1, TILE_L) f32
    if has_mask:
        x_ref, wi_ref, h_ref, ws_ref, mask_ref, out_ref = refs
    else:
        x_ref, wi_ref, h_ref, ws_ref, out_ref = refs

    # Cast the streamed tile to the compute dtype inside the kernel (cheap VPU
    # work hidden under the DMA; no extra HBM pass in the wrapper).
    x = x_ref[0].astype(compute_dtype)                                # (TILE_L, I)
    e = jnp.dot(x, wi_ref[...], preferred_element_type=jnp.float32)   # MXU, f32 acc
    # Per-batch hidden contribution + bias added in f32; tanh in compute dtype.
    e = jnp.tanh((e + h_ref[0]).astype(compute_dtype))                # (TILE_L, H)
    # (H -> 1) projection as an NT contraction -> lane-dense (1, TILE_L) row.
    s = jax.lax.dot_general(
        ws_ref[...], e,
        dimension_numbers=(((1,), (1,)), ((), ())),
        preferred_element_type=jnp.float32)                           # (1, TILE_L)
    s3 = s[None]                                                      # (1, 1, TILE_L)
    if has_mask:
        s3 = jnp.where(mask_ref[...] != 0, jnp.float32(-1e12), s3)
    out_ref[...] = s3


def _vmem_per_row_and_fixed(I, H, in_itemsize, comp_itemsize):
    """Lane-padding-aware VMEM bytes: per L-row cost and fixed (resident) cost."""
    i_lane = _round_up(I, 128)
    h_lane = _round_up(H, 128)
    per_row = (2 * i_lane * in_itemsize          # double-buffered emb tile
               + i_lane * comp_itemsize          # in-kernel cast copy
               + h_lane * (4 + comp_itemsize)    # f32 energy + compute-dtype tanh
               + 2 * (4 + 1))                    # out (f32) + mask (i8) slabs, x2 bufs
    fixed = (2 * _round_up(I, 8) * h_lane * comp_itemsize   # resident weight (x2 bufs)
             + 8 * h_lane * 4                               # h_term / ws rows
             + (1 << 20))                                   # compiler scratch headroom
    return per_row, fixed


def _choose_tile_l(L, B, per_row, fixed, vmem_budget):
    rows = max((vmem_budget - fixed) // per_row, 128)
    tile = int(min(rows, 8192))
    if tile >= L:
        tile = L
    else:
        tile = max((tile // 128) * 128, 128)
    # v7x has 2 TensorCores: a single-batch, single-tile call would leave one
    # core idle -- split L into >=2 (128-multiple) tiles when it is big enough.
    if B == 1 and tile >= L and L > 256:
        tile = _round_up(pl.cdiv(L, 2), 128)
    return tile


def score_forward(hidden, num_embeddings, attn_w, attn_b, score_w,
                  num_mask=None, *, tile_l=None, use_bf16=True):
    """hidden: (B,1,H); num_embeddings: (B,L,I);
       attn_w: (H, H+I)  (torch nn.Linear(hidden+input, hidden).weight);
       attn_b: (H,); score_w: (1, H) (torch nn.Linear(hidden, 1, bias=False).weight);
       num_mask: optional (B, L) bool, True => fill with -1e12.
       Returns (B, L) float32 scores.

       use_bf16=True is an opt-in speed/accuracy trade-off: the MXU is fed bf16
       (f32 accumulation) and tanh runs in bf16."""
    B, L, I = num_embeddings.shape
    H = hidden.shape[-1]
    assert hidden.shape == (B, 1, H)
    assert attn_w.shape == (H, H + I)
    assert attn_b.shape == (H,)
    assert score_w.shape == (1, H)

    comp_dtype = jnp.bfloat16 if use_bf16 else jnp.float32
    in_isz = jnp.dtype(num_embeddings.dtype).itemsize
    comp_isz = jnp.dtype(comp_dtype).itemsize

    # Split the attn weight: columns [:H] act on the repeated hidden state,
    # columns [H:] act on num_embeddings (cat([h, x]) never materialized).
    wa_h_t = attn_w[:, :H].T.astype(jnp.float32)           # (H, H)
    wa_i_t = attn_w[:, H:].T.astype(comp_dtype)            # (I, H), resident in kernel
    ws_row = score_w.reshape(1, H).astype(comp_dtype)      # (1, H)

    # Hidden contribution + bias: computed once per batch row (not L times).
    h_term = (hidden.reshape(B, H).astype(jnp.float32) @ wa_h_t
              + attn_b.astype(jnp.float32)).reshape(B, 1, H)

    # The dominant (B,L,I) stream stays in its native dtype: no wrapper cast,
    # no jnp.pad copy (ragged last blocks handled by Pallas boundary masking).
    emb = num_embeddings

    # Generation-aware VMEM budget -> tile size and scoped-VMEM limit.
    try:
        vmem_cap = int(pltpu.get_tpu_info().vmem_capacity_bytes)
        if vmem_cap <= 0:
            raise ValueError("bad vmem capacity")
    except Exception:
        vmem_cap = 64 << 20            # conservative: v7x per-TensorCore VMEM
    per_row, fixed = _vmem_per_row_and_fixed(I, H, in_isz, comp_isz)
    if tile_l is None:
        tile_l = _choose_tile_l(L, B, per_row, fixed, int(0.4 * vmem_cap))
    else:
        t = int(tile_l)
        tile_l = L if t >= L else max((t // 128) * 128, 128)
        if tile_l >= L:
            tile_l = L
    n_l = pl.cdiv(L, tile_l)

    est = per_row * tile_l + fixed
    vmem_limit = int(min(max(est * 3 // 2, 16 << 20), (vmem_cap * 3) // 4))

    has_mask = num_mask is not None
    kernel = functools.partial(_score_kernel, compute_dtype=comp_dtype,
                               has_mask=has_mask)

    in_specs = [
        pl.BlockSpec((1, tile_l, I), lambda b, l: (b, l, 0)),   # streamed emb tile
        pl.BlockSpec((I, H), lambda b, l: (0, 0)),              # resident weight
        pl.BlockSpec((1, 1, H), lambda b, l: (b, 0, 0)),        # per-batch hidden term
        pl.BlockSpec((1, H), lambda b, l: (0, 0)),              # score weight row
    ]
    operands = [emb, wa_i_t, h_term, ws_row]
    if has_mask:
        mask = num_mask.reshape(B, 1, L).astype(jnp.int8)       # 1 B/pos HBM traffic
        in_specs.append(pl.BlockSpec((1, 1, tile_l), lambda b, l: (b, 0, l)))
        operands.append(mask)

    out3 = pl.pallas_call(
        kernel,
        out_shape=jax.ShapeDtypeStruct((B, 1, L), jnp.float32),
        grid=(B, n_l),
        in_specs=in_specs,
        out_specs=pl.BlockSpec((1, 1, tile_l), lambda b, l: (b, 0, l)),
        compiler_params=pltpu.CompilerParams(
            dimension_semantics=("parallel", "parallel"),
            vmem_limit_bytes=vmem_limit),
    )(*operands)

    return out3.reshape(B, L)


def score_reference(hidden, num_embeddings, attn_w, attn_b, score_w, num_mask=None):
    """Pure-JAX f32 reference mirroring the PyTorch forward."""
    B, L, I = num_embeddings.shape
    H = hidden.shape[-1]
    hid_rep = jnp.broadcast_to(hidden, (B, L, H))
    energy_in = jnp.concatenate([hid_rep, num_embeddings], axis=2).reshape(B * L, H + I)
    s = (jnp.tanh(energy_in @ attn_w.T + attn_b) @ score_w.T).reshape(B, L)
    if num_mask is not None:
        s = jnp.where(num_mask, -1e12, s)
    return s


if __name__ == "__main__":
    # Small shapes consistent with the module's forward.
    B, L = 2, 8            # batch, max_len
    H, I = 32, 32          # hidden_size, input_size
    D = H + I

    key = jax.random.PRNGKey(0)
    k_h, k_e, k_wa, k_ba, k_ws, k_h2, k_e2 = jax.random.split(key, 7)

    hidden = jax.random.normal(k_h, (B, 1, H), dtype=jnp.float32)
    num_embeddings = jax.random.normal(k_e, (B, L, I), dtype=jnp.float32)

    # Parameter shapes per the nn.Linear definitions:
    #   attn.weight : (H, H+I), attn.bias : (H,);  score.weight : (1, H), no bias.
    attn_w = jax.random.normal(k_wa, (H, D), dtype=jnp.float32) * 0.1
    attn_b = jax.random.normal(k_ba, (H,), dtype=jnp.float32) * 0.1
    score_w = jax.random.normal(k_ws, (1, H), dtype=jnp.float32) * 0.1

    # Example padding mask (True = masked).
    lengths = jnp.array([6, 8], dtype=jnp.int32)
    num_mask = jnp.arange(L)[None, :] >= lengths[:, None]   # (B, L) bool

    ref = score_reference(hidden, num_embeddings, attn_w, attn_b, score_w, num_mask)

    # f32 path: must match the reference tightly.
    out_f32 = jax.block_until_ready(score_forward(
        hidden, num_embeddings, attn_w, attn_b, score_w, num_mask, use_bf16=False))
    assert out_f32.shape == (B, L)
    assert jnp.allclose(out_f32, ref, atol=1e-4, rtol=1e-4), (out_f32, ref)

    # bf16 compute path (opt-in): f32 accumulation, looser tolerance.
    out_bf16 = jax.block_until_ready(score_forward(
        hidden, num_embeddings, attn_w, attn_b, score_w, num_mask, use_bf16=True))
    assert out_bf16.shape == (B, L)
    assert jnp.allclose(out_bf16, ref, atol=3e-2, rtol=3e-2), (out_bf16, ref)

    # Masked positions must be exactly the fill value in both paths.
    assert jnp.all(jnp.where(num_mask, out_f32, -1e12) == jnp.float32(-1e12))
    assert jnp.all(jnp.where(num_mask, out_bf16, -1e12) == jnp.float32(-1e12))

    # No-mask path (mask stream skipped entirely).
    ref_nm = score_reference(hidden, num_embeddings, attn_w, attn_b, score_w, None)
    out_nm = jax.block_until_ready(score_forward(
        hidden, num_embeddings, attn_w, attn_b, score_w, None, use_bf16=False))
    assert jnp.allclose(out_nm, ref_nm, atol=1e-4, rtol=1e-4), (out_nm, ref_nm)

    # Ragged-L path: L not a multiple of tile_l -> no host-side jnp.pad of the
    # (B, L, I) stream; the last block relies on Pallas boundary masking.
    L2 = 200
    hidden2 = jax.random.normal(k_h2, (B, 1, H), dtype=jnp.float32)
    emb2 = jax.random.normal(k_e2, (B, L2, I), dtype=jnp.float32)
    lengths2 = jnp.array([130, 200], dtype=jnp.int32)
    mask2 = jnp.arange(L2)[None, :] >= lengths2[:, None]
    ref2 = score_reference(hidden2, emb2, attn_w, attn_b, score_w, mask2)
    out2 = jax.block_until_ready(score_forward(
        hidden2, emb2, attn_w, attn_b, score_w, mask2, tile_l=128, use_bf16=False))
    assert out2.shape == (B, L2)
    assert jnp.allclose(out2, ref2, atol=1e-4, rtol=1e-4), (out2, ref2)

    print("KERNEL_OK")
</pallas_src>

<mosaic_0001>
module attributes {stable_mosaic.version = 11 : i64} {
  func.func @_score_kernel(%arg0: i32, %arg1: i32, %arg2: memref<1x8x32xf32, #tpu.memory_space<vmem>>, %arg3: memref<32x32xf32, #tpu.memory_space<vmem>>, %arg4: memref<1x1x32xf32, #tpu.memory_space<vmem>>, %arg5: memref<1x32xf32, #tpu.memory_space<vmem>>, %arg6: memref<1x1x8xi8, #tpu.memory_space<vmem>>, %arg7: memref<1x1x8xf32, #tpu.memory_space<vmem>>) attributes {dimension_semantics = [#tpu.dimension_semantics<parallel>, #tpu.dimension_semantics<parallel>], iteration_bounds = array<i64: 2, 1>, scalar_prefetch = 0 : i64, scratch_operands = 0 : i64, tpu.core_type = #tpu.core_type<tc>, window_params = [{transform_indices = @transform_0, window_bounds = array<i64: 1, 8, 32>}, {pipeline_mode = #tpu.pipeline_mode<synchronous>, transform_indices = @transform_1, window_bounds = array<i64: 32, 32>}, {transform_indices = @transform_2, window_bounds = array<i64: 1, 1, 32>}, {pipeline_mode = #tpu.pipeline_mode<synchronous>, transform_indices = @transform_3, window_bounds = array<i64: 1, 32>}, {transform_indices = @transform_4, window_bounds = array<i64: 1, 1, 8>}, {transform_indices = @transform_5, window_bounds = array<i64: 1, 1, 8>}]} {
    %c0 = arith.constant 0 : index
    %c0_0 = arith.constant 0 : index
    %c0_1 = arith.constant 0 : index
    %0 = vector.load %arg2[%c0, %c0_0, %c0_1] : memref<1x8x32xf32, #tpu.memory_space<vmem>>, vector<1x8x32xf32>
    %1 = vector.shape_cast %0 : vector<1x8x32xf32> to vector<8x32xf32>
    %c0_2 = arith.constant 0 : index
    %c0_3 = arith.constant 0 : index
    %2 = vector.load %arg3[%c0_2, %c0_3] : memref<32x32xf32, #tpu.memory_space<vmem>>, vector<32x32xf32>
    %cst = arith.constant dense<0.000000e+00> : vector<8x32xf32>
    %3 = tpu.matmul %1, %2, %cst {dimension_numbers = #tpu.dot_dimension_numbers<[1], [0], [0], [1], [0, 0, 1, 1], [], []>} : vector<8x32xf32>, vector<32x32xf32>, vector<8x32xf32> -> vector<8x32xf32>
    %c0_4 = arith.constant 0 : index
    %c0_5 = arith.constant 0 : index
    %c0_6 = arith.constant 0 : index
    %4 = vector.load %arg4[%c0_4, %c0_5, %c0_6] : memref<1x1x32xf32, #tpu.memory_space<vmem>>, vector<1x1x32xf32>
    %5 = vector.shape_cast %4 : vector<1x1x32xf32> to vector<1x32xf32>
    %6 = vector.broadcast %5 : vector<1x32xf32> to vector<8x32xf32>
    %7 = arith.addf %3, %6 : vector<8x32xf32>
    %8 = math.tanh %7 : vector<8x32xf32>
    %c0_7 = arith.constant 0 : index
    %c0_8 = arith.constant 0 : index
    %9 = vector.load %arg5[%c0_7, %c0_8] : memref<1x32xf32, #tpu.memory_space<vmem>>, vector<1x32xf32>
    %cst_9 = arith.constant dense<0.000000e+00> : vector<1x8xf32>
    %10 = tpu.matmul %9, %8, %cst_9 {dimension_numbers = #tpu.dot_dimension_numbers<[1], [1], [0], [0], [0, 0, 1, 0], [], []>} : vector<1x32xf32>, vector<8x32xf32>, vector<1x8xf32> -> vector<1x8xf32>
    %11 = vector.shape_cast %10 : vector<1x8xf32> to vector<1x1x8xf32>
    %c0_10 = arith.constant 0 : index
    %c0_11 = arith.constant 0 : index
    %c0_12 = arith.constant 0 : index
    %12 = vector.load %arg6[%c0_10, %c0_11, %c0_12] : memref<1x1x8xi8, #tpu.memory_space<vmem>>, vector<1x1x8xi8>
    %c0_i8 = arith.constant 0 : i8
    %13 = vector.broadcast %c0_i8 : i8 to vector<1x1x8xi8>
    %14 = arith.cmpi ne, %12, %13 : vector<1x1x8xi8>
    %cst_13 = arith.constant -9.99999995E+11 : f32
    %15 = vector.broadcast %cst_13 : f32 to vector<1x1x8xf32>
    %16 = arith.select %14, %15, %11 : vector<1x1x8xi1>, vector<1x1x8xf32>
    %c0_14 = arith.constant 0 : index
    %c0_15 = arith.constant 0 : index
    %c0_16 = arith.constant 0 : index
    %17 = vector.load %arg7[%c0_14, %c0_15, %c0_16] : memref<1x1x8xf32, #tpu.memory_space<vmem>>, vector<1x1x8xf32>
    tpu.vector_store %arg7[%c0_14, %c0_15, %c0_16], %16 {strides = array<i32>} : memref<1x1x8xf32, #tpu.memory_space<vmem>>, vector<1x1x8xf32>,
    return
  }
  func.func @transform_0(%arg0: i32, %arg1: i32) -> (i32, i32, i32) {
    %c0_i32 = arith.constant 0 : i32
    %c0_i32_0 = arith.constant 0 : i32
    return %arg0, %arg1, %c0_i32 : i32, i32, i32
  }
  func.func @transform_1(%arg0: i32, %arg1: i32) -> (i32, i32) {
    %c0_i32 = arith.constant 0 : i32
    %c0_i32_0 = arith.constant 0 : i32
    %c0_i32_1 = arith.constant 0 : i32
    return %c0_i32, %c0_i32_0 : i32, i32
  }
  func.func @transform_2(%arg0: i32, %arg1: i32) -> (i32, i32, i32) {
    %c0_i32 = arith.constant 0 : i32
    %c0_i32_0 = arith.constant 0 : i32
    %c0_i32_1 = arith.constant 0 : i32
    return %arg0, %c0_i32, %c0_i32_0 : i32, i32, i32
  }
  func.func @transform_3(%arg0: i32, %arg1: i32) -> (i32, i32) {
    %c0_i32 = arith.constant 0 : i32
    %c0_i32_0 = arith.constant 0 : i32
    %c0_i32_1 = arith.constant 0 : i32
    return %c0_i32, %c0_i32_0 : i32, i32
  }
  func.func @transform_4(%arg0: i32, %arg1: i32) -> (i32, i32, i32) {
    %c0_i32 = arith.constant 0 : i32
    %c0_i32_0 = arith.constant 0 : i32
    return %arg0, %c0_i32, %arg1 : i32, i32, i32
  }
  func.func @transform_5(%arg0: i32, %arg1: i32) -> (i32, i32, i32) {
    %c0_i32 = arith.constant 0 : i32
    %c0_i32_0 = arith.constant 0 : i32
    return %arg0, %c0_i32, %arg1 : i32, i32, i32
  }
}

</mosaic_0001>

<bundles_post_ra>
// kernel: tpu_custom_call.1
= control target key start
LH: loop header
LB: loop body
LE: loop exit
PB: predicated region body
PF: predicated region fallthrough
CT: control target
= control target key end

     0   :  { %10 = vsyncpa [#allocation3], 0  ;;  %s1143_s0 = inlined_call_operand.hbm [shape: f32[2,8,32], index: 0, kind: input, shape index: {}]   ;;  %s1144_s1 = inlined_call_operand.hbm [shape: f32[32,32], index: 1, kind: input, shape index: {}]   ;;  %s1145_s2 = inlined_call_operand.vmem [shape: f32[2,1,32], index: 2, kind: input, shape index: {}]   ;;  %s1146_s3 = inlined_call_operand.vmem [shape: f32[1,32], index: 3, kind: input, shape index: {}]   ;;  %s1147_s4 = inlined_call_operand.vmem [shape: s8[2,1,8], index: 4, kind: input, shape index: {}]   ;;  %s1148_s5 = inlined_call_operand.hbm [shape: f32[2,1,8], index: 5, kind: output, shape index: {}]  }
   0x1   :  { %12 = vsyncpa [#allocation3 + $0x1], 0 }
   0x2   :  { %13 = vsyncpa [#allocation6], 0 }
   0x3   :  { %14 = vsyncpa [#allocation4], 0 }
   0x4   :  { %16 = vsyncpa [#allocation4 + $0x1], 0  ;;  %s917_s18 = smov 0   ;;  %s919_s19 = smov 0  }
   0x5   :  { %s921_s20 = smov 0   ;;  %s923_s21 = smov 0  }
   0x6   :  { %s925_s22 = smov 0   ;;  %s927_s23 = smov 0  }
   0x7 LB: > { %s605_s24 = sadd.s32 4294967295, %s876_s23   ;;  %s606_s25 = sadd.s32 4294967294, %s876_s23   ;;  %s876_s23 = sphi %s927_s23, %s22_s23   ;;  %s872_s22 = sphi %s925_s22, %s1172_s22   ;;  %s868_s21 = sphi %s923_s21, %s1171_s21   ;;  %s864_s20 = sphi %s921_s20, %s1170_s20   ;;  %s860_s19 = sphi %s919_s19, %s1169_s19   ;;  %s856_s18 = sphi %s917_s18, %s1168_s18  }
   0x8   : > { %p56_p0 = scmp.ne.s32.totalorder %s860_s19, %s856_s18  ;;  %p951_p1 = scmp.eq.s32.totalorder %s605_s24, 0 }
   0x9   : > { %p955_p2 = scmp.eq.s32.totalorder %s605_s24, 1  ;;  %p184_p3 = scmp.eq.s32.totalorder %s606_s25, 1 }
   0xa   : > { %s1153_s26 = scalar_select %p951_p1, 1, 0 }
   0xb   : > { %s1154_s27 = scalar_select %p955_p2, 1, 0 }
   0xc   : > { %p961_p4 = por %p951_p1, %p56_p0  ;;  %p607_p5 = scmp.ge.s32.totalorder %s876_s23, 1 }
   0xd   : > { %p966_p6 = por %p184_p3, %p56_p0  ;;  %p191_p7 = scmp.lt.s32.totalorder %s876_s23, 3 }
   0xe   : > { %s1155_s28 = scalar_select %p961_p4, 1, 0 }
   0xf   : > { %s1156_s29 = scalar_select %p966_p6, 1, 0 }
  0x10   : > { %p971_p8 = pnand %p607_p5, %p191_p7  ;;  %s878_s6 = smov [#allocation5]  }
  0x11   : > { %s203_s7 = sshll.u32 %s878_s6, 4  ;;  %s34_s9 = sadd.s32 1, %s872_s22  ;;  %s204_s7 = int_to_ptr.vmem [resolvable:$true] %s203_s7 }
  0x12   : > { %s1157_s30 = scalar_select %p971_p8, 1, 0 }
  0x13   : > { %p659_p9 = pneg %p971_p8  ;;  %s732_s12 = scalar_lea.hbm %s1144_s1, 512 }
  0x14   : > { %p733_p12 = scmp.ne.s32.totalorder %s1144_s1, %s732_s12  ;;  %p739_p5 = scmp.lt.u32.totalorder %s732_s12, %s1144_s1 }
  0x15   : > { %p980_p11 = pnand %p659_p9, %p951_p1 }
  0x17   : > { %p734_p13 = pneg %p980_p11 }
  0x19   : > { %p735_p0 = pnand %p734_p13, %p733_p12 }
  0x1b   : > { %p736_p3 = pneg %p735_p0 }
  0x1d   : > { %p741_p7 = pnand %p739_p5, %p736_p3 }
  0x1f   : > { %744 = shalt.err (!%p741_p7)
}
  0x20   : > { %s745_s17 = scalar_lea.vmem %s204_s7, 512  ;;  %p753_p1 = scmp.lt.s32.totalorder %s204_s7, %s204_s7 }
  0x21   : > { %p746_p9 = scmp.ne.s32.totalorder %s204_s7, %s745_s17  ;;  %p754_p4 = scmp.lt.s32.totalorder %s745_s17, %s745_s17 }
  0x23   : > { %p748_p10 = pnand %p746_p9, %p734_p13  ;;  %p755_p8 = por %p754_p4, %p753_p1 }
  0x25   : > { %p749_p6 = pneg %p748_p10 }
  0x27   : > { %p756_p2 = pnand %p755_p8, %p749_p6 }
  0x29   : > { %759 = shalt.err (!%p756_p2)
}
  0x2a   : > { %s879_s24 = smov 128   ;;  %s880_s25 = smov 8  }
  0x2b   : > { %662 = dma.hbm_to_vmem [thread:$0]  (!%p980_p11), %s1144_s1, 512, %s204_s7, [#allocation6], %s879_s24, %s879_s24, %s880_s25  }
  0x2c   : > { %p36_p1 = scmp.ge.s32.totalorder %s34_s9, 2  ;;  %s43_s11 = sadd.s32 1, %s864_s20 }
  0x2d   : > { %p50_p2 = scmp.ne.s32.totalorder %s864_s20, %s860_s19  ;;  %p51_p4 = scmp.eq.s32.totalorder %s876_s23, 0 }
  0x2e   : > { %s1174_s9 = smov (%p36_p1, %s34_s9), 0  ;;  %p1160_p8 = scmp.ne.s32.totalorder %s1154_s27, 0 }
  0x2f   : > { %p1007_p6 = por %p51_p4, %p50_p2  ;;  %s38_s8 = ssub.s32 %s872_s22, %s1174_s9 }
  0x30   : > { %p1013_p10 = por %p1160_p8, %p50_p2  ;;  %p672_p12 = scmp.lt.s32.totalorder %s876_s23, 2 }
  0x31   : > { %p41_p11 = scmp.eq.s32.totalorder %s38_s8, 0  ;;  %s220_s7 = sand.u32 1, %s864_s20  }
  0x32   : > { %s610_s14 = sshll.u32 %s220_s7, 3  ;;  %s611_s16 = sshll.u32 %s872_s22, 7 }
  0x33   : > { %s1022_s15 = scalar_select %p41_p11, %s864_s20, %s43_s11  }
  0x34   : > { %s1028_s25 = scalar_lea.hbm %s1143_s0, %s611_s16  ;;  %s224_s27 = scalar_lea.vmem [#allocation2], %s610_s14 }
  0x35   : > { %s232_s6 = sshll.u32 %s224_s27, 4  ;;  %p1034_p13 = pnand %p672_p12, %p1007_p6  ;;  %s1030_s6 = int_to_ptr.vmem [resolvable:$true] %s232_s6 }
  0x36   : > { %s221_s11 = scalar_lea.sflag [#allocation3], %s220_s7  ;;  %s760_s8 = scalar_lea.hbm %s1028_s25, 128 }
  0x37   : > { %p761_p0 = scmp.ne.s32.totalorder %s1028_s25, %s760_s8  ;;  %p762_p3 = pneg %p1034_p13 }
  0x38   : > { %s765_s17 = scalar_lea.hbm %s1143_s0, 256  ;;  %p766_p9 = scmp.lt.u32.totalorder %s1028_s25, %s1143_s0 }
  0x39   : > { %p763_p5 = pnand %p762_p3, %p761_p0  ;;  %p767_p1 = scmp.lt.u32.totalorder %s765_s17, %s760_s8 }
  0x3a   : > { %p769_p4 = scmp.lt.u32.totalorder %s760_s8, %s1028_s25 }
  0x3b   : > { %p764_p7 = pneg %p763_p5  ;;  %p768_p2 = por %p767_p1, %p766_p9 }
  0x3d   : > { %p770_p6 = por %p769_p4, %p768_p2 }
  0x3f   : > { %p771_p8 = pnand %p770_p6, %p764_p7 }
  0x41   : > { %774 = shalt.err (!%p771_p8)
}
  0x42   : > { %s775_s7 = scalar_lea.vmem %s1030_s6, 128  ;;  %s881_s27 = smov [#allocation2]  }
  0x43   : > { %p776_p12 = scmp.ne.s32.totalorder %s1030_s6, %s775_s7  ;;  %s780_s14 = sshll.u32 %s881_s27, 4  ;;  %s781_s14 = int_to_ptr.vmem [resolvable:$false] %s780_s14 }
  0x44   : > { %s782_s16 = scalar_lea.vmem %s781_s14, 256  ;;  %p783_p5 = scmp.lt.s32.totalorder %s1030_s6, %s781_s14 }
  0x45   : > { %p778_p11 = pnand %p776_p12, %p762_p3  ;;  %p784_p9 = scmp.lt.s32.totalorder %s782_s16, %s775_s7 }
  0x47   : > { %p779_p0 = pneg %p778_p11  ;;  %p785_p1 = por %p784_p9, %p783_p5 }
  0x49   : > { %p786_p2 = pnand %p785_p1, %p779_p0 }
  0x4b   : > { %789 = shalt.err (!%p786_p2)
}
  0x4c   : > { %666 = dma.hbm_to_vmem [thread:$0]  (!%p1034_p13), %s1028_s25, 128, %s1030_s6, %s221_s11  }
  0x4d   : > { %p1163_p7 = scmp.ne.s32.totalorder %s1157_s30, 0 }
  0x4e   : > { %s1066_s8 = sand.u32 (!%p1163_p7), 1, %s860_s19   ;;  %p1164_p3 = scmp.ne.s32.totalorder (!%p1163_p7), %s1155_s28, 0 }
  0x4f   : > { %256 = sbr.rel (%p1163_p7) target bundleno = 556 (0x22c), region = 40  ;;  %s613_s17 = sshll.u32 (!%p1163_p7), %s1066_s8, 3 }
  0x50   : > { %s259_s12 = scalar_lea.sflag (!%p1163_p7), [#allocation3], %s1066_s8  ;;  %s262_s24 = scalar_lea.vmem (!%p1163_p7), [#allocation2], %s613_s17 }
  0x56   : > { %843 = dma.done.wait (%p1164_p3), %s259_s12, 128  }
  0x57   : > { %845 = vsyncadd (%p1164_p3), %s259_s12, 4294967168  ;;  %p1165_p4 = scmp.ne.s32.totalorder %s1153_s26, 0 }
  0x59   : > { %847 = dma.done.wait (%p1165_p4), [#allocation6], 512  }
  0x5a   : > { %849 = vsyncadd (%p1165_p4), [#allocation6], 4294966784  ;;  %v882_v0 = vmov 0.0|0.0   ;;  %vm883_vm0 = vmmov 0   ;;  %v884_v1 = vmov 0.0   ;;  %v313_v2 = vld [vmem:[#allocation5] sm:$0xff] }
  0x5b   : > { %645 = vmatprep.subr.bf16.mxu0 %v882_v0  ;;  %637 = vmatprep.mubr.msk.f32.mxu0 %vm883_vm0, %v884_v1  ;;  %v314_v3 = vld [vmem:[#allocation5 + $0x8] sm:$0xff]  ;;  %v315_v4 = vld [vmem:[#allocation5 + $0x10] sm:$0xff]  ;;  %v316_v6 = vld [vmem:[#allocation5 + $0x18] sm:$0xff]  ;;  %vm324_vm1 = vcmask 261120   ;;  %p301_p13 = scmp.lt.s32.totalorder %s868_s21, 1  ;;  %v885_v16 = vmov 0  }
  0x5c   : > { %640 = vmatprep.subr.mxu1 %v884_v1  ;;  %642 = vmatprep.mubr.msk.f32.mxu1 %vm883_vm0, %v884_v1  ;;  %v646_v5 = vpack.c.bf16 %v314_v3, %v313_v2  ;;  %v649_v7 = vpack.c.bf16 %v316_v6, %v315_v4  ;;  %v312_v8 = vld [vmem:[%s262_s24] sm:$0xff]  ;;  %s619_s14 = sshll.u32 %s868_s21, 4  ;;  %s300_s16 = scalar_lea.vmem [#allocation7], %s1066_s8  ;;  %vm482_vm4 = vcmask 57344  }
  0x5d   : > { %s302_s26 = scalar_select %p301_p13, %s868_s21, 1  ;;  %v399_v14 = vld [vmem:[%s1146_s3] sm:$0x1] }
  0x5e   : > { %647 = vmatpush3.bf16.msra.mxu0 %v646_v5  ;;  %s498_s17 = sshll.u32 %s300_s16, 4  ;;  %s1094_s28 = scalar_lea.hbm %s1148_s5, %s619_s14  ;;  %s1096_s17 = int_to_ptr.vmem [resolvable:$true] %s498_s17 }
  0x5f   : > { %648 = vmatprep.subr.bf16.mxu0 %v882_v0  ;;  %s303_s25 = scalar_lea.vmem %s1145_s2, %s302_s26  ;;  %s309_s27 = scalar_lea.vmem %s1147_s4, %s302_s26 }
  0x60   : > { %v615_v9 = vld [vmem:[%s303_s25] ss:$0 sm:$0xff]  ;;  %s485_s26 = scalar_lea.sflag [#allocation4], %s1066_s8  ;;  %s790_s21 = scalar_lea.vmem %s1096_s17, 16 }
  0x61   : > { %v476_v15 = vld [vmem:[%s309_s27] sm:$0x1]  ;;  %p791_p6 = scmp.ne.s32.totalorder %s1096_s17, %s790_s21  ;;  %s886_s30 = smov [#allocation7]  }
  0x62   : > { %650 = vmatpush3.bf16.msra.mxu0 %v649_v7  ;;  %vm477_vm2 = vnez %v476_v15  ;;  %s794_s25 = sshll.u32 %s886_s30, 4  ;;  %s795_s25 = int_to_ptr.vmem [resolvable:$false] %s794_s25 }
  0x63   : > { %v478_v17 = vsel %vm477_vm2, 16843009, %v885_v16  ;;  %p792_p8 = pnand %p791_p6, %p1013_p10  ;;  %s796_s6 = scalar_lea.vmem %s795_s25, 32 }
  0x64   : > { %v479_v18 = vunpack.c.0.s8 %v478_v17  ;;  %p797_p11 = scmp.lt.s32.totalorder %s1096_s17, %s795_s25  ;;  %p798_p0 = scmp.lt.s32.totalorder %s796_s6, %s790_s21 }
  0x65   : > { %638 = vmatmul.mubr.msk.f32.vlgmr.msra.gmra.mrb[0].mxu0 %vm324_vm1, %v312_v8  ;;  %p793_p12 = pneg %p792_p8 }
  0x66   : > { %vm480_vm3 = vcmp.ne.s32.totalorder %v479_v18, 0  ;;  %p799_p5 = por %p798_p0, %p797_p11 }
  0x68   : > { %p800_p9 = pnand %p799_p5, %p793_p12 }
 0x138   : > { %v394_v10 = vpop.f32.mrb[0].mxu0 }
 0x139   : > { %v395_v11 = vadd.f32 %v615_v9, %v394_v10  ;;  %v639_v12 = vpop.f32.mrb[1].mxu0 }
 0x13b   : > { %730 = vtanh.f32 %v395_v11 }
 0x145   : > { %v731_v13 = vpop.eup %730 }
 0x146   : > { %641 = vmatpush3.xpose.msk.msra.mxu1 %vm324_vm1, %v731_v13 }
 0x149   : > { %643 = vmatmul.mubr.msk.f32.vlgmr.msra.gmra.mrb[0].mxu1 %vm324_vm1, %v399_v14 }
 0x21c   : > { %v472_v19 = vpop.f32.mrb[0].mxu1 }
 0x21d   : > { %v481_v20 = vsel %vm480_vm3, -1e+12, %v472_v19  ;;  %v644_v21 = vpop.f32.mrb[1].mxu1 }
 0x21e   : > { %483 = vst.msk [vmem:[%s300_s16] sm:$0x1] %vm482_vm4, %v481_v20 }
 0x21f   : > { %803 = shalt.err (!%p800_p9)
}
 0x220   : > { %s804_s8 = scalar_lea.hbm %s1094_s28, 16  ;;  %s808_s7 = scalar_lea.hbm %s1148_s5, 32 }
 0x221   : > { %p805_p1 = scmp.ne.s32.totalorder %s1094_s28, %s804_s8  ;;  %p809_p3 = scmp.lt.u32.totalorder %s1094_s28, %s1148_s5 }
 0x222   : > { %p810_p4 = scmp.lt.u32.totalorder %s808_s7, %s804_s8  ;;  %p812_p6 = scmp.lt.u32.totalorder %s804_s8, %s1094_s28 }
 0x223   : > { %p806_p2 = pnand %p805_p1, %p1013_p10 }
 0x224   : > { %p811_p13 = por %p810_p4, %p809_p3 }
 0x225   : > { %p807_p7 = pneg %p806_p2 }
 0x226   : > { %p813_p8 = por %p812_p6, %p811_p13 }
 0x228   : > { %p814_p12 = pnand %p813_p8, %p807_p7 }
 0x22a   : > { %817 = shalt.err (!%p814_p12)
}
 0x22b   : > { %657 = dma.vmem_to_hbm [thread:$0]  (%p1013_p10), %s1096_s17, 16, %s1094_s28, %s485_s26  }
 0x22c PF: > { %s510_s16 = sand.u32 1, %s856_s18   ;;  %p1166_p11 = scmp.ne.s32.totalorder %s1156_s29, 0 }
 0x22d   : > { %p1167_p0 = scmp.ge.s32.totalorder %s876_s23, 2  ;;  %s511_s12 = scalar_lea.sflag [#allocation4], %s510_s16 }
 0x22f   : > { %p668_p5 = pnand %p1167_p0, %p1166_p11 }
 0x231   : > { %851 = dma.done.wait (!%p668_p5), %s511_s12, 16  }
 0x232   : > { %853 = vsyncadd (!%p668_p5), %s511_s12, 4294967280  ;;  %s22_s23 = sadd.s32 1, %s876_s23   ;;  %s1168_s18 = smov %s860_s19 }
 0x233   : > { %p19_p9 = scmp.ge.s32.totalorder %s22_s23, 4   ;;  %s1169_s19 = smov %s864_s20 }
 0x234   : > { %s1170_s20 = smov %s1022_s15  ;;  %s1171_s21 = smov %s872_s22 }
 0x235   : > { %s1172_s22 = smov %s1174_s9  ;;  %21 = sbr.rel (!%p19_p9) target bundleno = 7 (0x7), region = 95 }
 0x23c   :  { %515 = vsyncpa [#allocation3], 1 }
 0x23d   :  { %517 = vsyncpa [#allocation3 + $0x1], 1 }
 0x23e   :  { %518 = vsyncpa [#allocation6], 1 }
 0x23f   :  { %519 = vsyncpa [#allocation4], 1 }
 0x240   :  { %521 = vsyncpa [#allocation4 + $0x1], 1 }

</bundles_post_ra>
